<compile_context>
chip_gen: v6e
topology: v6e:2x2x1
jax: 0.10.0
libtpu: 0.0.40
codegen_flags: <defaults>
</compile_context>

<pallas_src>
import jax
import jax.numpy as jnp
from jax import lax
from jax.experimental import pallas as pl
from jax.experimental.pallas import tpu as pltpu


def _cdiv(a, b):
    return -(-a // b)


def _round_up(a, b):
    return _cdiv(a, b) * b


def _auto_vmem_budget():
    """Generation-aware VMEM budgeting (v5e/v6e: 128 MiB, v7x: 64 MiB per TC)."""
    try:
        cap = int(pltpu.get_tpu_info().vmem_capacity_bytes)
    except Exception:  # conservative fallback == v7x per-core capacity
        cap = 64 * 1024 * 1024
    per_block = max(1 << 20, cap // 16)        # ~8 MiB (v5e/v6e), ~4 MiB (v7x)
    vmem_limit = int(min(cap * 5 // 8, 96 * 1024 * 1024))   # 80 MiB / 40 MiB
    return per_block, vmem_limit


def _make_mse_partial_kernel(B, C, bm, bc, nc_inner,
                             mask_rows, mask_cols, row_unroll):
    """Build the kernel: accumulate sum((s-t)^2) of a (bm, bc) tile into an
    (8, 128) lane-dense partial that stays VMEM-resident across the class axis."""
    n_row_groups = bm // 8
    n_lane_groups = bc // 128

    def kernel(s_ref, t_ref, p_ref):
        p = pl.program_id(0)   # parallel class chunk (used when nb == 1)
        i = pl.program_id(1)   # parallel row block
        j = pl.program_id(2)   # class block inside chunk: innermost reduction

        @pl.when(j == 0)
        def _():
            p_ref[...] = jnp.zeros_like(p_ref)

        # Hoisted iotas (JAX does not CSE broadcast_in_dim inside loops).
        if mask_rows:
            sub_iota = lax.broadcasted_iota(jnp.int32, (8, 128), 0)
            row_base = i * bm
        if mask_cols:
            lane_iota = lax.broadcasted_iota(jnp.int32, (8, 128), 1)
            col_base = (p * nc_inner + j) * bc

        def row_body(r, acc):
            roff = pl.multiple_of(r * 8, 8)          # dynamic, 8-aligned sublane start
            if mask_rows:
                row_ok = (row_base + roff + sub_iota) < B
            # Static 128-aligned lane slices: each chunk is one vreg -> tiny live set.
            for g in range(n_lane_groups):
                s = s_ref[pl.ds(roff, 8), pl.ds(g * 128, 128)].astype(jnp.float32)
                t = t_ref[pl.ds(roff, 8), pl.ds(g * 128, 128)].astype(jnp.float32)
                d = s - t
                d2 = d * d
                # Out-of-bounds block contents are undefined -> must mask (select,
                # so NaN/Inf garbage cannot leak through).
                if mask_rows and mask_cols:
                    ok = row_ok & ((col_base + g * 128 + lane_iota) < C)
                    d2 = jnp.where(ok, d2, 0.0)
                elif mask_rows:
                    d2 = jnp.where(row_ok, d2, 0.0)
                elif mask_cols:
                    ok = (col_base + g * 128 + lane_iota) < C
                    d2 = jnp.where(ok, d2, 0.0)
                acc = acc + d2
            return acc

        acc = lax.fori_loop(0, n_row_groups, row_body,
                            jnp.zeros((8, 128), jnp.float32),
                            unroll=row_unroll)
        p_ref[...] += acc

    return kernel


def logits_kd_loss(out_s, out_t, lambda_kd=1.0, *, per_block_bytes=None,
                   vmem_limit_bytes=None):
    """F.mse_loss(out_s, out_t) * lambda_kd as a Pallas TPU kernel.

    out_s, out_t: (B, C) logits (any float dtypes, may differ). Returns f32 scalar.
    """
    assert out_s.shape == out_t.shape, (out_s.shape, out_t.shape)
    B, C = out_s.shape
    n_true = B * C
    assert n_true > 0

    auto_pb, auto_vmem = _auto_vmem_budget()
    pb = int(per_block_bytes) if per_block_bytes is not None else auto_pb
    vmem_limit = int(vmem_limit_bytes) if vmem_limit_bytes is not None else auto_vmem

    itemsize_s = jnp.dtype(out_s.dtype).itemsize
    itemsize_t = jnp.dtype(out_t.dtype).itemsize
    itemsize = max(itemsize_s, itemsize_t)       # no wrapper-side promotion
    elems_budget = max(1, pb // itemsize)

    # --- class (lane) tile: multiple of 128; sized so a full-batch block fills
    #     the budget; capped so the static lane-group unroll stays bounded.
    MAX_LANE_GROUPS = 128                        # <= 128 statically-unrolled chunks
    bm_full = _round_up(B, 8)
    bc_budget = max(128, (elems_budget // bm_full) // 128 * 128)
    bc = min(_round_up(C, 128), MAX_LANE_GROUPS * 128, bc_budget)
    nc_total = _cdiv(C, bc)

    # --- row (sublane) tile: multiple of 8, fills the remaining budget.
    bm_budget = max(8, (elems_budget // bc) // 8 * 8)
    bm = min(bm_full, bm_budget)
    nb = _cdiv(B, bm)

    # --- make sure a parallel grid axis has >= 2 blocks (v7x has 2 TCs).
    if nb == 1 and nc_total >= 2:
        # tiny batch / many class blocks: 2-way parallel class-chunk split
        # (does not shrink the DMA block size at all).
        n_pc, nc_inner = 2, _cdiv(nc_total, 2)
    else:
        if nb == 1 and B > 8:
            bm = _round_up(_cdiv(B, 2), 8)       # split rows instead
            nb = _cdiv(B, bm)
        elif nb > 1:
            bm = _round_up(_cdiv(B, nb), 8)      # rebalance the last row block
            nb = _cdiv(B, bm)
        n_pc, nc_inner = 1, nc_total

    covered_rows = nb * bm
    covered_cols = n_pc * nc_inner * bc
    mask_rows = covered_rows > B
    mask_cols = covered_cols > C
    need_clamp = (n_pc * nc_inner) > nc_total    # a fully out-of-range class block exists

    # --- row-group loop unroll: small, and a divisor of the trip count.
    n_row_groups = bm // 8
    n_lane_groups = bc // 128
    target_unroll = max(1, 8 // n_lane_groups)
    row_unroll = 1
    for u in range(min(target_unroll, n_row_groups), 0, -1):
        if n_row_groups % u == 0:
            row_unroll = u
            break

    def _class_block(p, j):
        cb = p * nc_inner + j
        if need_clamp:
            # Re-read the last valid block; its contribution is fully masked to 0.
            cb = jnp.minimum(cb, nc_total - 1)
        return cb

    in_spec = pl.BlockSpec((bm, bc), lambda p, i, j: (i, _class_block(p, j)))
    out_spec = pl.BlockSpec((8, 128), lambda p, i, j: (p * nb + i, 0))

    kernel = _make_mse_partial_kernel(B, C, bm, bc, nc_inner,
                                      mask_rows, mask_cols, row_unroll)

    cost = pl.CostEstimate(
        flops=int(3 * n_true),
        transcendentals=0,
        bytes_accessed=int(n_true * (itemsize_s + itemsize_t)
                           + n_pc * nb * 8 * 128 * 4),
    )

    partials = pl.pallas_call(
        kernel,
        out_shape=jax.ShapeDtypeStruct((n_pc * nb * 8, 128), jnp.float32),
        grid_spec=pltpu.PrefetchScalarGridSpec(
            num_scalar_prefetch=0,
            grid=(n_pc, nb, nc_inner),
            in_specs=[in_spec, in_spec],
            out_specs=out_spec,
        ),
        compiler_params=pltpu.CompilerParams(
            dimension_semantics=("parallel", "parallel", "arbitrary"),
            vmem_limit_bytes=vmem_limit,
        ),
        cost_estimate=cost,
    )(out_s, out_t)

    scale = jnp.float32(float(lambda_kd) / float(n_true))
    # Single tiny cross-lane/sublane reduce of the lane-dense partials.
    return jnp.sum(partials) * scale


if __name__ == "__main__":
    key = jax.random.PRNGKey(0)

    def ref_loss(s, t, lam):
        return jnp.mean((s.astype(jnp.float32) - t.astype(jnp.float32)) ** 2) * lam

    def check(B, C, dtype_s, dtype_t, lam, **kw):
        ks, kt = jax.random.split(jax.random.fold_in(key, B * 100003 + C))
        s = jax.random.normal(ks, (B, C), dtype=jnp.float32).astype(dtype_s)
        t = jax.random.normal(kt, (B, C), dtype=jnp.float32).astype(dtype_t)
        loss = logits_kd_loss(s, t, lambda_kd=lam, **kw)
        jax.block_until_ready(loss)
        ref = ref_loss(s, t, lam)
        assert jnp.allclose(loss, ref, rtol=1e-5, atol=1e-6), (
            B, C, dtype_s, dtype_t, loss, ref)

    # aligned shapes, auto (generation-aware) budget
    check(8, 128, jnp.float32, jnp.float32, 1.0)
    # ragged rows + classes: exercises in-kernel masking (no jnp.pad HBM copies)
    check(10, 200, jnp.float32, jnp.float32, 0.5)
    # mixed dtypes: no wrapper-side promotion, casts happen in-kernel
    check(16, 384, jnp.bfloat16, jnp.float32, 1.0)
    # tiny block budget override: multi-block grid with masks on both axes
    check(10, 200, jnp.float32, jnp.float32, 1.0, per_block_bytes=8192)
    # tiny batch + 2 class blocks: 2-way parallel class-chunk split (even)
    check(4, 640, jnp.bfloat16, jnp.bfloat16, 1.0, per_block_bytes=8192)
    # tiny batch + 3 class blocks: class split with clamped duplicate (odd)
    check(4, 640, jnp.float32, jnp.float32, 1.0, per_block_bytes=8192)

    print("KERNEL_OK")
</pallas_src>

<mosaic_0001>
module attributes {stable_mosaic.version = 11 : i64} {
  func.func @kernel(%arg0: i32, %arg1: i32, %arg2: i32, %arg3: memref<8x128xf32, #tpu.memory_space<vmem>>, %arg4: memref<8x128xf32, #tpu.memory_space<vmem>>, %arg5: memref<8x128xf32, #tpu.memory_space<vmem>>) attributes {dimension_semantics = [#tpu.dimension_semantics<parallel>, #tpu.dimension_semantics<parallel>, #tpu.dimension_semantics<arbitrary>], iteration_bounds = array<i64: 1, 1, 1>, scalar_prefetch = 0 : i64, scratch_operands = 0 : i64, tpu.core_type = #tpu.core_type<tc>, window_params = [{transform_indices = @transform_0, window_bounds = array<i64: 8, 128>}, {transform_indices = @transform_1, window_bounds = array<i64: 8, 128>}, {transform_indices = @transform_2, window_bounds = array<i64: 8, 128>}]} {
    %c0_i32 = arith.constant 0 : i32
    %0 = arith.cmpi eq, %arg2, %c0_i32 : i32
    %1 = arith.extui %0 : i1 to i32
    %c0_i32_0 = arith.constant 0 : i32
    %2 = arith.cmpi ne, %1, %c0_i32_0 : i32
    scf.if %2 {
      %cst_7 = arith.constant 0.000000e+00 : f32
      %16 = vector.broadcast %cst_7 : f32 to vector<8x128xf32>
      %c0_8 = arith.constant 0 : index
      %c0_9 = arith.constant 0 : index
      %17 = vector.load %arg5[%c0_8, %c0_9] : memref<8x128xf32, #tpu.memory_space<vmem>>, vector<8x128xf32>
      tpu.vector_store %arg5[%c0_8, %c0_9], %16 {strides = array<i32>} : memref<8x128xf32, #tpu.memory_space<vmem>>, vector<8x128xf32>,
    } else {
    }
    %cst = arith.constant 0.000000e+00 : f32
    %3 = vector.broadcast %cst : f32 to vector<8x128xf32>
    %c0_i32_1 = arith.constant 0 : i32
    %c8_i32 = arith.constant 8 : i32
    %4 = arith.muli %c0_i32_1, %c8_i32 : i32
    %5 = tpu.assume_multiple %4, 8 : i32
    %6 = arith.index_cast %5 : i32 to index
    %c0 = arith.constant 0 : index
    %7 = vector.load %arg3[%6, %c0] : memref<8x128xf32, #tpu.memory_space<vmem>>, vector<8x128xf32>
    %8 = arith.index_cast %5 : i32 to index
    %c0_2 = arith.constant 0 : index
    %9 = vector.load %arg4[%8, %c0_2] : memref<8x128xf32, #tpu.memory_space<vmem>>, vector<8x128xf32>
    %10 = arith.subf %7, %9 : vector<8x128xf32>
    %11 = arith.mulf %10, %10 : vector<8x128xf32>
    %12 = arith.addf %3, %11 : vector<8x128xf32>
    %c1_i32 = arith.constant 1 : i32
    %c0_3 = arith.constant 0 : index
    %c0_4 = arith.constant 0 : index
    %13 = vector.load %arg5[%c0_3, %c0_4] : memref<8x128xf32, #tpu.memory_space<vmem>>, vector<8x128xf32>
    %14 = arith.addf %13, %12 : vector<8x128xf32>
    %c0_5 = arith.constant 0 : index
    %c0_6 = arith.constant 0 : index
    %15 = vector.load %arg5[%c0_5, %c0_6] : memref<8x128xf32, #tpu.memory_space<vmem>>, vector<8x128xf32>
    tpu.vector_store %arg5[%c0_5, %c0_6], %14 {strides = array<i32>} : memref<8x128xf32, #tpu.memory_space<vmem>>, vector<8x128xf32>,
    return
  }
  func.func @transform_0(%arg0: i32, %arg1: i32, %arg2: i32) -> (i32, i32) {
    %c1_i32 = arith.constant 1 : i32
    %0 = arith.muli %arg0, %c1_i32 : i32
    %1 = arith.addi %0, %arg2 : i32
    %c0_i32 = arith.constant 0 : i32
    return %arg1, %1 : i32, i32
  }
  func.func @transform_1(%arg0: i32, %arg1: i32, %arg2: i32) -> (i32, i32) {
    %c1_i32 = arith.constant 1 : i32
    %0 = arith.muli %arg0, %c1_i32 : i32
    %1 = arith.addi %0, %arg2 : i32
    %c0_i32 = arith.constant 0 : i32
    return %arg1, %1 : i32, i32
  }
  func.func @transform_2(%arg0: i32, %arg1: i32, %arg2: i32) -> (i32, i32) {
    %c1_i32 = arith.constant 1 : i32
    %0 = arith.muli %arg0, %c1_i32 : i32
    %1 = arith.addi %0, %arg1 : i32
    %c0_i32 = arith.constant 0 : i32
    %c0_i32_0 = arith.constant 0 : i32
    return %1, %c0_i32 : i32, i32
  }
}

</mosaic_0001>

<bundles_post_ra>
// kernel: tpu_custom_call.1
= control target key start
LH: loop header
LB: loop body
LE: loop exit
PB: predicated region body
PF: predicated region fallthrough
CT: control target
= control target key end

     0   :  { %7 = vsyncpa [#allocation3], 0  ;;  %s174_s0 = inlined_call_operand.hbm [shape: f32[8,128], index: 0, kind: input, shape index: {}]   ;;  %s175_s1 = inlined_call_operand.hbm [shape: f32[8,128], index: 1, kind: input, shape index: {}]   ;;  %s176_s2 = inlined_call_operand.hbm [shape: f32[8,128], index: 2, kind: output, shape index: {}]  }
   0x1   :  { %8 = vsyncpa [#allocation6], 0 }
   0x2   :  { %9 = vsyncpa [#allocation4], 0  ;;  %s147_s9 = smov [#allocation2]   ;;  %s148_s11 = smov [#allocation5]  }
   0x3   :  { %s19_s10 = sshll.u32 %s147_s9, 4  ;;  %s32_s12 = sshll.u32 %s148_s11, 4  ;;  %s20_s10 = int_to_ptr.vmem [resolvable:$true] %s19_s10  ;;  %s33_s12 = int_to_ptr.vmem [resolvable:$true] %s32_s12 }
   0x4   :  { %s89_s13 = scalar_lea.vmem %s20_s10, 128  ;;  %p94_p1 = scmp.lt.s32.totalorder %s20_s10, %s20_s10 }
   0x5   :  { %p90_p0 = scmp.ne.s32.totalorder %s20_s10, %s89_s13  ;;  %p95_p2 = scmp.lt.s32.totalorder %s89_s13, %s89_s13 }
   0x7   :  { %p96_p3 = por %p95_p2, %p94_p1 }
   0x9   :  { %p97_p4 = pnand %p96_p3, %p90_p0 }
   0xb   :  { %100 = shalt.err (!%p97_p4)
}
   0xc   :  { %22 = dma.hbm_to_vmem [thread:$0]  %s174_s0, 128, %s20_s10, [#allocation3]  }
   0xd   :  { %s109_s16 = scalar_lea.vmem %s33_s12, 128  ;;  %p114_p6 = scmp.lt.s32.totalorder %s33_s12, %s33_s12 }
   0xe   :  { %p110_p5 = scmp.ne.s32.totalorder %s33_s12, %s109_s16  ;;  %p115_p7 = scmp.lt.s32.totalorder %s109_s16, %s109_s16 }
  0x10   :  { %p116_p8 = por %p115_p7, %p114_p6 }
  0x12   :  { %p117_p9 = pnand %p116_p8, %p110_p5 }
  0x14   :  { %120 = shalt.err (!%p117_p9)
}
  0x15   :  { %35 = dma.hbm_to_vmem [thread:$0]  %s175_s1, 128, %s33_s12, [#allocation6]  }
  0x16   :  { %141 = dma.done.wait [#allocation3], 128  }
  0x17   :  { %142 = vsyncadd [#allocation3], 4294967168 }
  0x18   :  { %143 = dma.done.wait [#allocation6], 128  }
  0x19   :  { %144 = vsyncadd [#allocation6], 4294967168  ;;  %v50_v0 = vld [vmem:[#allocation2] sm:$0xff]  ;;  %v51_v1 = vld [vmem:[#allocation5] sm:$0xff]  ;;  %s149_s19 = smov [#allocation7]  }
  0x1a   :  { %v52_v2 = vsub.f32 %v50_v0, %v51_v1  ;;  %s67_s0 = sshll.u32 %s149_s19, 4  ;;  %s68_s0 = int_to_ptr.vmem [resolvable:$true] %s67_s0 }
  0x1b   :  { %s121_s20 = scalar_lea.vmem %s68_s0, 128  ;;  %p126_p11 = scmp.lt.s32.totalorder %s68_s0, %s68_s0 }
  0x1c   :  { %v53_v3 = vmul.f32 %v52_v2, %v52_v2  ;;  %p122_p10 = scmp.ne.s32.totalorder %s68_s0, %s121_s20  ;;  %p127_p12 = scmp.lt.s32.totalorder %s121_s20, %s121_s20 }
  0x1e   :  { %57 = vst [vmem:[#allocation7] sm:$0xff] %v53_v3  ;;  %p128_p13 = por %p127_p12, %p126_p11 }
  0x20   :  { %p129_p0 = pnand %p128_p13, %p122_p10 }
  0x22   :  { %132 = shalt.err (!%p129_p0)
}
  0x23   :  { %70 = dma.vmem_to_hbm [thread:$0]  %s68_s0, 128, %s176_s2, [#allocation4]  }
  0x24   :  { %145 = dma.done.wait [#allocation4], 128  }
  0x25   :  { %146 = vsyncadd [#allocation4], 4294967168 }
  0x26   :  { %74 = vsyncpa [#allocation3], 1 }
  0x27   :  { %75 = vsyncpa [#allocation6], 1 }
  0x28   :  { %76 = vsyncpa [#allocation4], 1 }

</bundles_post_ra>
